<compile_context>
chip_gen: v5e
topology: v5e:2x2
jax: 0.10.0
libtpu: 0.0.40
codegen_flags: <defaults>
</compile_context>

<pallas_src>
import functools

import jax
import jax.numpy as jnp
from jax.experimental import pallas as pl
from jax.experimental.pallas import tpu as pltpu

_NEG_LARGE = -1e30  # finite stand-in for -inf (avoids NaN on fully-masked rows)


def _vmem_capacity_bytes():
    """Physical VMEM of the attached TPU (fallback: v7x's 64 MiB per core)."""
    try:
        cap = int(pltpu.get_tpu_info().vmem_capacity_bytes)
        if cap > 0:
            return cap
    except Exception:
        pass
    return 64 << 20


def _q_tile_candidates(lq):
    # Cap at 256: matches v6e/v7x 256x256 MXU and keeps the (tq, Lk) f32
    # intermediates inside v7x's smaller VMEM; 128-multiples feed v5e's 4x128^2.
    cands = [c for c in (256, 128, 64, 32, 16, 8) if c <= lq and lq % c == 0]
    return cands if cands else [lq]


def _pick_block_b(B, Lq, Lk):
    # Pack several batch elements per grid step for tiny per-batch tiles so the
    # step isn't dominated by the ~0.35us fixed overhead (and the MXU tile
    # isn't an (8, 8) corner).
    return B if (Lq <= 128 and Lk <= 256 and B <= 8) else 1


# ----------------------------------------------------------------------------
# Kernel bodies
# ----------------------------------------------------------------------------
def _attn_kernel(q_ref, k_ref, v_ref, *rest, inv_temperature, has_mask):
    """Full-row softmax; K/V resident per batch step; emits output AND attn."""
    if has_mask:
        mask_ref, out_ref, attn_ref = rest
    else:
        out_ref, attn_ref = rest

    # Fold 1/temperature into q (O(tq*Dk)) instead of scaling (tq, Lk) scores.
    q = q_ref[...]
    q = q * jnp.asarray(inv_temperature, dtype=q.dtype)

    # scores = q @ k^T : contraction over Dk, batched over bb; native-dtype MXU
    # operands, f32 accumulation, no explicit transpose (no XLU transpose).
    s = jnp.einsum("bqd,bkd->bqk", q, k_ref[...],
                   preferred_element_type=jnp.float32)
    if has_mask:
        s = jnp.where(mask_ref[...] != 0, _NEG_LARGE, s)

    m = jnp.max(s, axis=-1, keepdims=True)
    e = jnp.exp(s - m)
    denom = jnp.sum(e, axis=-1, keepdims=True)
    # Exact divide: attention weights are exported, keep rows summing to 1.
    p = (e / denom).astype(v_ref.dtype)

    # Store attn BEFORE the PV matmul so the f32 intermediates retire early;
    # the single cast `p` is reused as the MXU operand.
    attn_ref[...] = p.astype(attn_ref.dtype)

    out = jnp.einsum("bqk,bkd->bqd", p, v_ref[...],
                     preferred_element_type=jnp.float32)
    out_ref[...] = out.astype(out_ref.dtype)
    # dropout: eval-mode identity


def _flash_kernel(q_ref, k_ref, v_ref, *rest, inv_temperature, has_mask):
    """Output-only flash path: key axis tiled, online softmax, no attn writeback."""
    if has_mask:
        mask_ref, out_ref, m_sc, l_sc, acc_sc = rest
    else:
        out_ref, m_sc, l_sc, acc_sc = rest

    ki = pl.program_id(2)

    @pl.when(ki == 0)
    def _():
        m_sc[...] = jnp.full_like(m_sc, _NEG_LARGE)
        l_sc[...] = jnp.zeros_like(l_sc)
        acc_sc[...] = jnp.zeros_like(acc_sc)

    q = q_ref[...]
    q = q * jnp.asarray(inv_temperature, dtype=q.dtype)
    s = jnp.einsum("bqd,bkd->bqk", q, k_ref[...],
                   preferred_element_type=jnp.float32)
    if has_mask:
        s = jnp.where(mask_ref[...] != 0, _NEG_LARGE, s)

    m_prev = m_sc[...]
    m_new = jnp.maximum(m_prev, jnp.max(s, axis=-1, keepdims=True))
    alpha = jnp.exp(m_prev - m_new)
    p = jnp.exp(s - m_new)
    l_sc[...] = alpha * l_sc[...] + jnp.sum(p, axis=-1, keepdims=True)
    acc_sc[...] = alpha * acc_sc[...] + jnp.einsum(
        "bqk,bkd->bqd", p.astype(v_ref.dtype), v_ref[...],
        preferred_element_type=jnp.float32)
    m_sc[...] = m_new

    @pl.when(ki == pl.num_programs(2) - 1)
    def _():
        out_ref[...] = (acc_sc[...]
                        * pl.reciprocal(l_sc[...], approx=True)
                        ).astype(out_ref.dtype)


# ----------------------------------------------------------------------------
# Wrapper
# ----------------------------------------------------------------------------
def scaled_dot_product_attention(q, k, v, mask=None, *, temperature,
                                 return_attn=True,
                                 block_q=None, block_b=None, block_k=None):
    """Pallas implementation of ScaledDotProductAttention.forward (eval mode).

    return_attn=True  -> (output, attn)    (module semantics)
    return_attn=False -> output only       (flash-style kernel, no attn writeback)
    """
    B, Lq, Dk = q.shape
    Bk, Lk, Dkk = k.shape
    Bv, Lv, Dv = v.shape
    assert Bk == B and Bv == B and Dkk == Dk and Lv == Lk

    has_mask = mask is not None
    inv_temperature = 1.0 / float(temperature)
    itemsize = q.dtype.itemsize

    cap = _vmem_capacity_bytes()
    tile_budget = int(cap * 0.6)                  # headroom for pipelining/regalloc
    vmem_limit = min(int(cap * 0.9), 128 << 20)   # explicit scoped-VMEM limit

    bb = block_b if block_b is not None else _pick_block_b(B, Lq, Lk)
    assert B % bb == 0

    # Advisory cost hint for XLA's scheduler.
    flops = 2 * B * Lq * Lk * (Dk + Dv)
    transcendentals = B * Lq * Lk
    base_bytes = (B * Lq * Dk + B * Lk * Dk + B * Lk * Dv + B * Lq * Dv) * itemsize
    if has_mask:
        base_bytes += B * Lq * Lk  # int8 mask

    if return_attn:
        # ----- Path A: K/V resident per batch step, attn written to HBM -----
        if block_q is None:
            tq = None
            for cand in _q_tile_candidates(Lq):
                tiles = 2 * bb * ((cand * Dk + Lk * Dk + Lk * Dv
                                   + cand * Dv + cand * Lk) * itemsize
                                  + (cand * Lk if has_mask else 0))
                live = 3 * bb * cand * Lk * 4      # f32 scores/e/attn
                if tiles + live <= tile_budget:
                    tq = cand
                    break
            if tq is None:
                tq = _q_tile_candidates(Lq)[-1]
        else:
            tq = block_q
        assert Lq % tq == 0

        grid = (B // bb, Lq // tq)
        q_spec = pl.BlockSpec((bb, tq, Dk), lambda b, i: (b, i, 0))
        k_spec = pl.BlockSpec((bb, Lk, Dk), lambda b, i: (b, 0, 0))
        v_spec = pl.BlockSpec((bb, Lk, Dv), lambda b, i: (b, 0, 0))
        out_spec = pl.BlockSpec((bb, tq, Dv), lambda b, i: (b, i, 0))
        attn_spec = pl.BlockSpec((bb, tq, Lk), lambda b, i: (b, i, 0))

        in_specs = [q_spec, k_spec, v_spec]
        args = [q, k, v]
        if has_mask:
            in_specs.append(pl.BlockSpec((bb, tq, Lk), lambda b, i: (b, i, 0)))
            args.append(mask.astype(jnp.int8))

        kernel = functools.partial(_attn_kernel,
                                   inv_temperature=inv_temperature,
                                   has_mask=has_mask)
        cost = pl.CostEstimate(
            flops=flops, transcendentals=transcendentals,
            bytes_accessed=base_bytes + B * Lq * Lk * itemsize)  # + attn writeback

        out, attn = pl.pallas_call(
            kernel,
            out_shape=(jax.ShapeDtypeStruct((B, Lq, Dv), q.dtype),
                       jax.ShapeDtypeStruct((B, Lq, Lk), q.dtype)),
            grid_spec=pltpu.PrefetchScalarGridSpec(
                num_scalar_prefetch=0, grid=grid,
                in_specs=in_specs, out_specs=[out_spec, attn_spec]),
            compiler_params=pltpu.CompilerParams(
                dimension_semantics=("parallel", "parallel"),
                vmem_limit_bytes=vmem_limit),
            cost_estimate=cost,
        )(*args)
        return out, attn

    # ----- Path B: output-only flash kernel (key axis tiled, online softmax) -----
    if block_k is None:
        if Lk % 256 == 0:
            tk = 256
        elif Lk % 128 == 0:
            tk = 128
        else:
            tk = Lk
    else:
        tk = block_k
    assert Lk % tk == 0

    if block_q is None:
        tq = None
        for cand in _q_tile_candidates(Lq):
            tiles = 2 * bb * ((cand * Dk + tk * Dk + tk * Dv + cand * Dv) * itemsize
                              + (cand * tk if has_mask else 0))
            scratch = bb * (cand * Dv + 2 * cand) * 4
            live = 3 * bb * cand * tk * 4
            if tiles + scratch + live <= tile_budget:
                tq = cand
                break
        if tq is None:
            tq = _q_tile_candidates(Lq)[-1]
    else:
        tq = block_q
    assert Lq % tq == 0

    grid = (B // bb, Lq // tq, Lk // tk)
    q_spec = pl.BlockSpec((bb, tq, Dk), lambda b, i, j: (b, i, 0))
    k_spec = pl.BlockSpec((bb, tk, Dk), lambda b, i, j: (b, j, 0))
    v_spec = pl.BlockSpec((bb, tk, Dv), lambda b, i, j: (b, j, 0))
    out_spec = pl.BlockSpec((bb, tq, Dv), lambda b, i, j: (b, i, 0))

    in_specs = [q_spec, k_spec, v_spec]
    args = [q, k, v]
    if has_mask:
        in_specs.append(pl.BlockSpec((bb, tq, tk), lambda b, i, j: (b, i, j)))
        args.append(mask.astype(jnp.int8))

    kernel = functools.partial(_flash_kernel,
                               inv_temperature=inv_temperature,
                               has_mask=has_mask)
    cost = pl.CostEstimate(flops=flops, transcendentals=transcendentals,
                           bytes_accessed=base_bytes)

    out = pl.pallas_call(
        kernel,
        out_shape=jax.ShapeDtypeStruct((B, Lq, Dv), q.dtype),
        grid_spec=pltpu.PrefetchScalarGridSpec(
            num_scalar_prefetch=0, grid=grid,
            in_specs=in_specs, out_specs=out_spec,
            scratch_shapes=[pltpu.VMEM((bb, tq, 1), jnp.float32),
                            pltpu.VMEM((bb, tq, 1), jnp.float32),
                            pltpu.VMEM((bb, tq, Dv), jnp.float32)]),
        compiler_params=pltpu.CompilerParams(
            dimension_semantics=("parallel", "parallel", "arbitrary"),
            vmem_limit_bytes=vmem_limit),
        cost_estimate=cost,
    )(*args)
    return out


# ----------------------------------------------------------------------------
# Self-test
# ----------------------------------------------------------------------------
if __name__ == "__main__":
    def reference(q, k, v, mask, temperature):
        hp = jax.lax.Precision.HIGHEST
        attn = jnp.einsum("bqd,bkd->bqk", q, k, precision=hp) / temperature
        if mask is not None:
            attn = jnp.where(mask, -jnp.inf, attn)
        attn = jax.nn.softmax(attn, axis=2)
        out = jnp.einsum("bqk,bkd->bqd", attn, v, precision=hp)
        return out, attn

    key = jax.random.PRNGKey(0)
    sub = jax.random.split(key, 8)

    # --- Small shapes consistent with the module: batch=2, seq=8, d_k=d_v=32 ---
    B, Lq, Lk, Dk, Dv = 2, 8, 8, 32, 32
    temperature = float(Dk) ** 0.5
    q = jax.random.normal(sub[0], (B, Lq, Dk), dtype=jnp.float32)
    k = jax.random.normal(sub[1], (B, Lk, Dk), dtype=jnp.float32)
    v = jax.random.normal(sub[2], (B, Lk, Dv), dtype=jnp.float32)
    mask = jax.random.bernoulli(sub[3], p=0.2, shape=(B, Lq, Lk))
    mask = mask.at[:, :, 0].set(False)  # never a fully-masked row (ref would NaN)

    out_ref, attn_ref = reference(q, k, v, mask, temperature)

    out, attn = scaled_dot_product_attention(q, k, v, mask, temperature=temperature)
    jax.block_until_ready((out, attn))
    assert jnp.allclose(out, out_ref, atol=2e-3, rtol=2e-3), "output mismatch (masked)"
    assert jnp.allclose(attn, attn_ref, atol=2e-3, rtol=2e-3), "attn mismatch (masked)"

    out_nm, attn_nm = scaled_dot_product_attention(q, k, v, None, temperature=temperature)
    jax.block_until_ready((out_nm, attn_nm))
    out_nm_ref, attn_nm_ref = reference(q, k, v, None, temperature)
    assert jnp.allclose(out_nm, out_nm_ref, atol=2e-3, rtol=2e-3), "output mismatch (no mask)"
    assert jnp.allclose(attn_nm, attn_nm_ref, atol=2e-3, rtol=2e-3), "attn mismatch (no mask)"

    out_fl = scaled_dot_product_attention(q, k, v, mask, temperature=temperature,
                                          return_attn=False)
    out_fl = jax.block_until_ready(out_fl)
    assert jnp.allclose(out_fl, out_ref, atol=2e-3, rtol=2e-3), "output mismatch (flash masked)"

    # --- Modestly larger shape to exercise q-tiling and key-axis (flash) tiling ---
    B2, Lq2, Lk2, Dk2, Dv2 = 2, 256, 512, 64, 64
    temperature2 = float(Dk2) ** 0.5
    q2 = jax.random.normal(sub[4], (B2, Lq2, Dk2), dtype=jnp.float32)
    k2 = jax.random.normal(sub[5], (B2, Lk2, Dk2), dtype=jnp.float32)
    v2 = jax.random.normal(sub[6], (B2, Lk2, Dv2), dtype=jnp.float32)
    mask2 = jax.random.bernoulli(sub[7], p=0.2, shape=(B2, Lq2, Lk2))
    mask2 = mask2.at[:, :, 0].set(False)

    out2_ref, attn2_ref = reference(q2, k2, v2, mask2, temperature2)

    out2, attn2 = scaled_dot_product_attention(q2, k2, v2, mask2,
                                               temperature=temperature2)
    jax.block_until_ready((out2, attn2))
    assert jnp.allclose(out2, out2_ref, atol=2e-3, rtol=2e-3), "output mismatch (large masked)"
    assert jnp.allclose(attn2, attn2_ref, atol=2e-3, rtol=2e-3), "attn mismatch (large masked)"

    out2_fl = scaled_dot_product_attention(q2, k2, v2, mask2,
                                           temperature=temperature2,
                                           return_attn=False)
    out2_fl = jax.block_until_ready(out2_fl)
    assert jnp.allclose(out2_fl, out2_ref, atol=2e-3, rtol=2e-3), "output mismatch (large flash)"

    print("KERNEL_OK")
</pallas_src>

<mosaic_0001>
module attributes {stable_mosaic.version = 11 : i64} {
  func.func @_attn_kernel(%arg0: i32, %arg1: i32, %arg2: memref<2x8x32xf32, #tpu.memory_space<vmem>>, %arg3: memref<2x8x32xf32, #tpu.memory_space<vmem>>, %arg4: memref<2x8x32xf32, #tpu.memory_space<vmem>>, %arg5: memref<2x8x8xi8, #tpu.memory_space<vmem>>, %arg6: memref<2x8x32xf32, #tpu.memory_space<vmem>>, %arg7: memref<2x8x8xf32, #tpu.memory_space<vmem>>) attributes {dimension_semantics = [#tpu.dimension_semantics<parallel>, #tpu.dimension_semantics<parallel>], iteration_bounds = array<i64: 1, 1>, scalar_prefetch = 0 : i64, scratch_operands = 0 : i64, tpu.core_type = #tpu.core_type<tc>, window_params = [{transform_indices = @transform_0, window_bounds = array<i64: 2, 8, 32>}, {transform_indices = @transform_1, window_bounds = array<i64: 2, 8, 32>}, {transform_indices = @transform_2, window_bounds = array<i64: 2, 8, 32>}, {transform_indices = @transform_3, window_bounds = array<i64: 2, 8, 8>}, {transform_indices = @transform_4, window_bounds = array<i64: 2, 8, 32>}, {transform_indices = @transform_5, window_bounds = array<i64: 2, 8, 8>}]} {
    %c0 = arith.constant 0 : index
    %c0_0 = arith.constant 0 : index
    %c0_1 = arith.constant 0 : index
    %0 = vector.load %arg2[%c0, %c0_0, %c0_1] : memref<2x8x32xf32, #tpu.memory_space<vmem>>, vector<2x8x32xf32>
    %cst = arith.constant 0.176776692 : f32
    %1 = vector.broadcast %cst : f32 to vector<2x8x32xf32>
    %2 = arith.mulf %0, %1 : vector<2x8x32xf32>
    %c0_2 = arith.constant 0 : index
    %c0_3 = arith.constant 0 : index
    %c0_4 = arith.constant 0 : index
    %3 = vector.load %arg3[%c0_2, %c0_3, %c0_4] : memref<2x8x32xf32, #tpu.memory_space<vmem>>, vector<2x8x32xf32>
    "tpu.trace_start"() <{level = 10 : i32, message = "bqd,bkd->bqk"}> : () -> ()
    %cst_5 = arith.constant dense<0.000000e+00> : vector<2x8x8xf32>
    %4 = tpu.matmul %2, %3, %cst_5 {dimension_numbers = #tpu.dot_dimension_numbers<[2], [2], [1], [1], [0, 0, 0, 1, 1, 1], [0], [0]>} : vector<2x8x32xf32>, vector<2x8x32xf32>, vector<2x8x8xf32> -> vector<2x8x8xf32>
    "tpu.trace_stop"() : () -> ()
    %c0_6 = arith.constant 0 : index
    %c0_7 = arith.constant 0 : index
    %c0_8 = arith.constant 0 : index
    %5 = vector.load %arg5[%c0_6, %c0_7, %c0_8] : memref<2x8x8xi8, #tpu.memory_space<vmem>>, vector<2x8x8xi8>
    %c0_i8 = arith.constant 0 : i8
    %6 = vector.broadcast %c0_i8 : i8 to vector<2x8x8xi8>
    %7 = arith.cmpi ne, %5, %6 : vector<2x8x8xi8>
    %cst_9 = arith.constant -1.000000e+30 : f32
    %8 = vector.broadcast %cst_9 : f32 to vector<2x8x8xf32>
    %9 = arith.select %7, %8, %4 : vector<2x8x8xi1>, vector<2x8x8xf32>
    %cst_10 = arith.constant dense<0xFF800000> : vector<2x8xf32>
    %10 = vector.multi_reduction <maximumf>, %9, %cst_10 [2] : vector<2x8x8xf32> to vector<2x8xf32>
    %11 = vector.shape_cast %10 : vector<2x8xf32> to vector<2x8x1xf32>
    %12 = vector.broadcast %11 : vector<2x8x1xf32> to vector<2x8x8xf32>
    %13 = arith.subf %9, %12 : vector<2x8x8xf32>
    %14 = math.exp %13 : vector<2x8x8xf32>
    %cst_11 = arith.constant dense<0.000000e+00> : vector<2x8xf32>
    %15 = vector.multi_reduction <add>, %14, %cst_11 [2] : vector<2x8x8xf32> to vector<2x8xf32>
    %16 = vector.shape_cast %15 : vector<2x8xf32> to vector<2x8x1xf32>
    %17 = vector.broadcast %16 : vector<2x8x1xf32> to vector<2x8x8xf32>
    %18 = arith.divf %14, %17 : vector<2x8x8xf32>
    %c0_12 = arith.constant 0 : index
    %c0_13 = arith.constant 0 : index
    %c0_14 = arith.constant 0 : index
    %19 = vector.load %arg7[%c0_12, %c0_13, %c0_14] : memref<2x8x8xf32, #tpu.memory_space<vmem>>, vector<2x8x8xf32>
    tpu.vector_store %arg7[%c0_12, %c0_13, %c0_14], %18 {strides = array<i32>} : memref<2x8x8xf32, #tpu.memory_space<vmem>>, vector<2x8x8xf32>,
    %c0_15 = arith.constant 0 : index
    %c0_16 = arith.constant 0 : index
    %c0_17 = arith.constant 0 : index
    %20 = vector.load %arg4[%c0_15, %c0_16, %c0_17] : memref<2x8x32xf32, #tpu.memory_space<vmem>>, vector<2x8x32xf32>
    "tpu.trace_start"() <{level = 10 : i32, message = "bqk,bkd->bqd"}> : () -> ()
    %cst_18 = arith.constant dense<0.000000e+00> : vector<2x8x32xf32>
    %21 = tpu.matmul %18, %20, %cst_18 {dimension_numbers = #tpu.dot_dimension_numbers<[2], [1], [1], [2], [0, 0, 0, 1, 1, 2], [0], [0]>} : vector<2x8x8xf32>, vector<2x8x32xf32>, vector<2x8x32xf32> -> vector<2x8x32xf32>
    "tpu.trace_stop"() : () -> ()
    %c0_19 = arith.constant 0 : index
    %c0_20 = arith.constant 0 : index
    %c0_21 = arith.constant 0 : index
    %22 = vector.load %arg6[%c0_19, %c0_20, %c0_21] : memref<2x8x32xf32, #tpu.memory_space<vmem>>, vector<2x8x32xf32>
    tpu.vector_store %arg6[%c0_19, %c0_20, %c0_21], %21 {strides = array<i32>} : memref<2x8x32xf32, #tpu.memory_space<vmem>>, vector<2x8x32xf32>,
    return
  }
  func.func @transform_0(%arg0: i32, %arg1: i32) -> (i32, i32, i32) {
    %c0_i32 = arith.constant 0 : i32
    %c0_i32_0 = arith.constant 0 : i32
    return %arg0, %arg1, %c0_i32 : i32, i32, i32
  }
  func.func @transform_1(%arg0: i32, %arg1: i32) -> (i32, i32, i32) {
    %c0_i32 = arith.constant 0 : i32
    %c0_i32_0 = arith.constant 0 : i32
    %c0_i32_1 = arith.constant 0 : i32
    return %arg0, %c0_i32, %c0_i32_0 : i32, i32, i32
  }
  func.func @transform_2(%arg0: i32, %arg1: i32) -> (i32, i32, i32) {
    %c0_i32 = arith.constant 0 : i32
    %c0_i32_0 = arith.constant 0 : i32
    %c0_i32_1 = arith.constant 0 : i32
    return %arg0, %c0_i32, %c0_i32_0 : i32, i32, i32
  }
  func.func @transform_3(%arg0: i32, %arg1: i32) -> (i32, i32, i32) {
    %c0_i32 = arith.constant 0 : i32
    %c0_i32_0 = arith.constant 0 : i32
    return %arg0, %arg1, %c0_i32 : i32, i32, i32
  }
  func.func @transform_4(%arg0: i32, %arg1: i32) -> (i32, i32, i32) {
    %c0_i32 = arith.constant 0 : i32
    %c0_i32_0 = arith.constant 0 : i32
    return %arg0, %arg1, %c0_i32 : i32, i32, i32
  }
  func.func @transform_5(%arg0: i32, %arg1: i32) -> (i32, i32, i32) {
    %c0_i32 = arith.constant 0 : i32
    %c0_i32_0 = arith.constant 0 : i32
    return %arg0, %arg1, %c0_i32 : i32, i32, i32
  }
}

</mosaic_0001>

<bundles_post_ra>
// kernel: tpu_custom_call.1
= control target key start
LH: loop header
LB: loop body
LE: loop exit
PB: predicated region body
PF: predicated region fallthrough
CT: control target
= control target key end

     0   :  { %11 = vsyncpa [#allocation3], 0  ;;  %s564_s0 = inlined_call_operand.hbm [shape: f32[2,8,32], index: 0, kind: input, shape index: {}]   ;;  %s565_s1 = inlined_call_operand.hbm [shape: f32[2,8,32], index: 1, kind: input, shape index: {}]   ;;  %s566_s2 = inlined_call_operand.hbm [shape: f32[2,8,32], index: 2, kind: input, shape index: {}]   ;;  %s567_s3 = inlined_call_operand.hbm [shape: s8[2,8,8], index: 3, kind: input, shape index: {}]   ;;  %s568_s4 = inlined_call_operand.hbm [shape: f32[2,8,32], index: 4, kind: output, shape index: {0}]   ;;  %s569_s5 = inlined_call_operand.hbm [shape: f32[2,8,8], index: 5, kind: output, shape index: {1}]  }
   0x1   :  { %12 = vsyncpa [#allocation6], 0 }
   0x2   :  { %13 = vsyncpa [#allocation9], 0 }
   0x3   :  { %14 = vsyncpa [#allocation4], 0 }
   0x4   :  { %15 = vsyncpa [#allocation12], 0  ;;  %s33_s20 = sshll.u32 %s565_s1, 4  ;;  %s476_s21 = smov [#allocation5]   ;;  %s34_s20 = int_to_ptr.hbm [resolvable:$true] %s33_s20 }
   0x5   :  { %s35_s22 = sshll.u32 %s476_s21, 4  ;;  %s20_s25 = sshll.u32 %s564_s0, 4  ;;  %s36_s22 = int_to_ptr.vmem [resolvable:$true] %s35_s22  ;;  %s21_s25 = int_to_ptr.hbm [resolvable:$true] %s20_s25 }
   0x6   :  { %s477_s26 = smov 128   ;;  %s478_s27 = smov 8  }
   0x7   :  { %41 = dma.hbm_to_vmem [thread:$0]  %s34_s20, 256, %s36_s22, [#allocation6], %s477_s26, %s477_s26, %s478_s27  }
   0x8   :  { %s479_s28 = smov [#allocation2]   ;;  %s46_s1 = sshll.u32 %s566_s2, 4  ;;  %s47_s1 = int_to_ptr.hbm [resolvable:$true] %s46_s1 }
   0x9   :  { %s22_s29 = sshll.u32 %s479_s28, 4  ;;  %s59_s8 = sshll.u32 %s567_s3, 4  ;;  %s23_s29 = int_to_ptr.vmem [resolvable:$true] %s22_s29  ;;  %s60_s8 = int_to_ptr.hbm [resolvable:$true] %s59_s8 }
   0xa   :  { %28 = dma.hbm_to_vmem [thread:$0]  %s21_s25, 256, %s23_s29, [#allocation3], %s477_s26, %s477_s26, %s478_s27  }
   0xb   :  { %s480_s9 = smov [#allocation7]   ;;  %s481_s11 = smov [#allocation8]  }
   0xc   :  { %s48_s10 = sshll.u32 %s480_s9, 4  ;;  %s61_s2 = sshll.u32 %s481_s11, 4  ;;  %s49_s10 = int_to_ptr.vmem [resolvable:$true] %s48_s10  ;;  %s62_s2 = int_to_ptr.vmem [resolvable:$true] %s61_s2 }
   0xd   :  { %54 = dma.hbm_to_vmem [thread:$0]  %s47_s1, 256, %s49_s10, [#allocation6], %s477_s26, %s477_s26, %s478_s27  }
   0xe   :  { %s482_s12 = smov 32   ;;  %s483_s13 = smov 2  }
   0xf   :  { %67 = dma.hbm_to_vmem [thread:$0]  %s60_s8, 64, %s62_s2, [#allocation9], %s482_s12, %s482_s12, %s483_s13  }
  0x10   :  { %466 = dma.done.wait [#allocation3], 256  }
  0x11   :  { %467 = vsyncadd [#allocation3], 4294967040 }
  0x12   :  { %468 = dma.done.wait [#allocation6], 512  }
  0x13   :  { %469 = vsyncadd [#allocation6], 4294966784 }
  0x14   :  { %470 = dma.done.wait [#allocation9], 64  }
  0x15   :  { %471 = vsyncadd [#allocation9], 4294967232  ;;  %vm92_vm0 = vcmask 261120   ;;  %v90_v0 = vld [vmem:[#allocation5] sm:$0xff]  ;;  %v86_v1 = vld [vmem:[#allocation2] sm:$0xff]  ;;  %v484_v8 = vmov 0  }
  0x16   :  { %v91_v2 = vld [vmem:[#allocation5 + $0x8] sm:$0xff]  ;;  %297 = vmatpush.xpose.msk.msra.mxu0 %vm92_vm0, %v90_v0  ;;  %v88_v3 = vmul.f32 0.17677669, %v86_v1  ;;  %v87_v4 = vld [vmem:[#allocation2 + $0x8] sm:$0xff]  ;;  %v145_v6 = vld [vmem:[#allocation8] sm:$0x3] }
  0x17   :  { %299 = vmatpush.xpose.msk.msra.mxu1 %vm92_vm0, %v91_v2  ;;  %v89_v5 = vmul.f32 0.17677669, %v87_v4  ;;  %vm147_vm1 = vnez %v145_v6  ;;  %v146_v7 = vld [vmem:[#allocation8 + $0x2] sm:$0x3]  ;;  %vm157_vm4 = vcmask 64512   ;;  %v208_v29 = vld [vmem:[#allocation7] sm:$0xff] }
  0x18   :  { %v149_v9 = vsel %vm147_vm1, 16843009, %v484_v8  ;;  %vm148_vm2 = vnez %v146_v7  ;;  %228 = vmatpush.msra.mxu2 %v208_v29  ;;  %v209_v30 = vld [vmem:[#allocation7 + $0x8] sm:$0xff]  ;;  %s485_s3 = smov [#allocation11]   ;;  %s277_s17 = sshll.u32 %s569_s5, 4  ;;  %s278_s17 = int_to_ptr.hbm [resolvable:$true] %s277_s17 }
  0x19   :  { %298 = vmatmul.msk.f32.vlgmr.msra.gmra.mxu0 %vm92_vm0, %v88_v3  ;;  %v151_v10 = vunpack.c.0.s8 %v149_v9  ;;  %v150_v11 = vsel %vm148_vm2, 16843009, %v484_v8  ;;  %251 = vmatpush.msra.mxu3 %v209_v30  ;;  %s275_s14 = sshll.u32 %s485_s3, 4  ;;  %s486_s18 = smov [#allocation10]   ;;  %s276_s14 = int_to_ptr.vmem [resolvable:$true] %s275_s14 }
  0x1a   :  { %300 = vmatmul.msk.f32.vlgmr.msra.gmra.mxu1 %vm92_vm0, %v89_v5  ;;  %v152_v12 = vunpack.c.0.s8 %v150_v11  ;;  %s262_s19 = sshll.u32 %s486_s18, 4  ;;  %s264_s22 = sshll.u32 %s568_s4, 4  ;;  %s263_s19 = int_to_ptr.vmem [resolvable:$true] %s262_s19  ;;  %s265_s22 = int_to_ptr.hbm [resolvable:$true] %s264_s22 }
  0x1b   :  { %vm153_vm3 = vcmp.ne.s32.totalorder %v151_v10, 0 }
  0x1c   :  { %vm154_vm5 = vcmp.ne.s32.totalorder %v152_v12, 0 }
  0x96   :  { %v116_v13 = vpop.f32.mrf.mxu0 }
  0x97   :  { %v155_v14 = vsel %vm153_vm3, -1e+30, %v116_v13  ;;  %v142_v16 = vpop.f32.mrf.mxu1 }
  0x98   :  { %v158_v15 = vsel %vm157_vm4, %v155_v14, -inf  ;;  %v156_v17 = vsel %vm154_vm5, -1e+30, %v142_v16 }
  0x99   :  { %159 = vmax.xlane.f32.xlu0 %v158_v15  ;;  %v161_v18 = vsel %vm157_vm4, %v156_v17, -inf }
  0xa1   :  { %162 = vmax.xlane.f32.xlu0 %v161_v18 }
 0x10c   :  { %v160_v19 = vpop.xlane.xlu0 %159 }
 0x10d   :  { %v164_v20 = vsub.f32 %v155_v14, %v160_v19 }
 0x10f   :  { %v166_v21 = vmul.f32 1.442695, %v164_v20 }
 0x111   :  { %314 = vpow2.f32 %v166_v21 }
 0x114   :  { %v163_v22 = vpop.xlane.xlu0 %162 }
 0x115   :  { %v165_v23 = vsub.f32 %v156_v17, %v163_v22 }
 0x117   :  { %v315_v24 = vpop.eup %314  ;;  %v168_v25 = vmul.f32 1.442695, %v165_v23 }
 0x118   :  { %v170_v26 = vsel %vm157_vm4, %v315_v24, 0.0 }
 0x119   :  { %316 = vpow2.f32 %v168_v25  ;;  %171 = vadd.xlane.f32.xlu1 %v170_v26 }
 0x11f   :  { %v317_v27 = vpop.eup %316 }
 0x120   :  { %v173_v28 = vsel %vm157_vm4, %v317_v27, 0.0 }
 0x121   :  { %174 = vadd.xlane.f32.xlu1 %v173_v28 }
 0x18c   :  { %v172_v31 = vpop.xlane.xlu1 %171 }
 0x18d   :  { %318 = vrcp.f32 %v172_v31  ;;  %v187_v36 = vand.u32 2147483648, %v172_v31  ;;  %v185_v38 = vand.u32 2147483647, %v172_v31  ;;  %vm181_vm7 = vweird.f32 %v172_v31 }
 0x18f   :  { %v188_v41 = vor.u32 1.1754944e-38, %v187_v36  ;;  %vm186_vm9 = vcmp.eq.f32.partialorder %v185_v38, 8.507059e+37 }
 0x193   :  { %v319_v32 = vpop.eup %318 }
 0x194   :  { %v177_v33 = vmul.f32 %v319_v32, %v172_v31  ;;  %v175_v34 = vpop.xlane.xlu1 %174  ;;  %vm182_vm6 = vweird.f32 %v319_v32 }
 0x195   :  { %320 = vrcp.f32 %v175_v34  ;;  %vm183_vm8 = vmor %vm181_vm7, %vm182_vm6  ;;  %v202_v47 = vand.u32 2147483648, %v175_v34  ;;  %v200_v49 = vand.u32 2147483647, %v175_v34  ;;  %vm196_vm11 = vweird.f32 %v175_v34 }
 0x196   :  { %v178_v35 = vsub.f32 1.0, %v177_v33 }
 0x197   :  { %v203_v51 = vor.u32 1.1754944e-38, %v202_v47  ;;  %vm201_vm13 = vcmp.eq.f32.partialorder %v200_v49, 8.507059e+37 }
 0x198   :  { %v179_v37 = vmul.f32 %v319_v32, %v178_v35 }
 0x19a   :  { %v180_v39 = vadd.f32 %v319_v32, %v179_v37 }
 0x19b   :  { %v321_v40 = vpop.eup %320 }
 0x19c   :  { %v192_v42 = vmul.f32 %v321_v40, %v175_v34  ;;  %v184_v43 = vsel %vm183_vm8, %v319_v32, %v180_v39  ;;  %vm197_vm10 = vweird.f32 %v321_v40 }
 0x19d   :  { %v189_v44 = vsel %vm186_vm9, %v188_v41, %v184_v43  ;;  %vm198_vm12 = vmor %vm196_vm11, %vm197_vm10 }
 0x19e   :  { %v193_v45 = vsub.f32 1.0, %v192_v42  ;;  %v190_v46 = vmul.f32 %v315_v24, %v189_v44 }
 0x1a0   :  { %v194_v48 = vmul.f32 %v321_v40, %v193_v45  ;;  %301 = vmatmul.msk.f32.vlgmr.msra.gmra.mxu2 %vm157_vm4, %v190_v46  ;;  %206 = vst.msk [vmem:[#allocation11] sm:$0xff] %vm157_vm4, %v190_v46 }
 0x1a2   :  { %v195_v50 = vadd.f32 %v321_v40, %v194_v48 }
 0x1a4   :  { %v199_v52 = vsel %vm198_vm12, %v321_v40, %v195_v50 }
 0x1a5   :  { %v204_v53 = vsel %vm201_vm13, %v203_v51, %v199_v52 }
 0x1a6   :  { %v205_v54 = vmul.f32 %v317_v27, %v204_v53 }
 0x1a8   :  { %302 = vmatmul.msk.f32.vlgmr.msra.gmra.mxu3 %vm157_vm4, %v205_v54  ;;  %207 = vst.msk [vmem:[#allocation11 + $0x8] sm:$0xff] %vm157_vm4, %v205_v54 }
 0x1a9   :  { %283 = dma.vmem_to_hbm [thread:$0]  %s276_s14, 256, %s278_s17, [#allocation12], %s477_s26, %s477_s26, %s478_s27  }
 0x223   :  { %v230_v55 = vpop.f32.mrf.mxu2 }
 0x224   :  { %256 = vst.msk [vmem:[#allocation10] sm:$0xff] %vm92_vm0, %v230_v55 }
 0x22b   :  { %v253_v56 = vpop.f32.mrf.mxu3 }
 0x22c   :  { %257 = vst.msk [vmem:[#allocation10 + $0x8] sm:$0xff] %vm92_vm0, %v253_v56 }
 0x22d   :  { %270 = dma.vmem_to_hbm [thread:$0]  %s263_s19, 256, %s265_s22, [#allocation4], %s477_s26, %s477_s26, %s478_s27  }
 0x22e   :  { %472 = dma.done.wait [#allocation4], 256  }
 0x22f   :  { %473 = vsyncadd [#allocation4], 4294967040 }
 0x230   :  { %474 = dma.done.wait [#allocation12], 256  }
 0x231   :  { %475 = vsyncadd [#allocation12], 4294967040 }
 0x232   :  { %292 = vsyncpa [#allocation3], 1 }
 0x233   :  { %293 = vsyncpa [#allocation6], 1 }
 0x234   :  { %294 = vsyncpa [#allocation9], 1 }
 0x235   :  { %295 = vsyncpa [#allocation4], 1 }
 0x236   :  { %296 = vsyncpa [#allocation12], 1 }

</bundles_post_ra>
